<compile_context>
chip_gen: v6e
topology: v6e:2x2x1
jax: 0.10.0
libtpu: 0.0.40
codegen_flags: <defaults>
</compile_context>

<pallas_src>
import functools

import jax
import jax.numpy as jnp
from jax import lax
from jax.experimental import pallas as pl
from jax.experimental.pallas import tpu as pltpu

BN_EPS = 1e-5


def _round_up(v, m):
    return ((v + m - 1) // m) * m


def _device_kind():
    try:
        return jax.devices()[0].device_kind.lower()
    except Exception:
        return ""


def _gen_params(kind):
    """Returns (tn_max, tk_max, vmem_cap_bytes) per TPU generation."""
    if "v7" in kind:
        # 64 MiB VMEM per TC -> leave pipeline headroom.
        return 256, 512, 48 << 20
    if "v6" in kind:
        # 128 MiB VMEM: big tiles cut per-step overhead and x re-streaming.
        return 512, 1024, 100 << 20
    if "v5" in kind:
        # v5e: mem-bound on a 128-wide MXU; larger tn buys nothing.
        return 256, 512, 100 << 20
    return 256, 512, 64 << 20


def _vmem_need(B, tn, tk, x_bytes, w_bytes, out_bytes):
    need = 2 * B * tk * x_bytes        # double-buffered x tiles
    need += 2 * tn * tk * w_bytes      # double-buffered w tiles (dominant stream)
    need += 2 * B * tn * out_bytes     # double-buffered out tiles
    need += B * tn * 4                 # f32 accumulator scratch
    need += 2 * 3 * tn * 4             # bias / gamma / beta tiles
    return int(need * 1.25) + (2 << 20)


def _layer_wrapper_kernel(x_ref, w_ref, b_ref, g_ref, be_ref, out_ref, acc_ref,
                          *, rescale: bool, batch: int, compute_dtype):
    k = pl.program_id(1)

    @pl.when(k == 0)
    def _():
        acc_ref[...] = jnp.zeros_like(acc_ref)

    # x tile: (B, tk); w tile: (tn, tk) -> contract over K without transposing w
    # in the wrapper.  Casts are no-ops when params are already stored in
    # compute_dtype (recommended: bf16 in HBM).
    x = x_ref[...]
    w = w_ref[...]
    if x.dtype != compute_dtype:
        x = x.astype(compute_dtype)
    if w.dtype != compute_dtype:
        w = w.astype(compute_dtype)
    acc_ref[...] += lax.dot_general(
        x, w,
        dimension_numbers=(((1,), (1,)), ((), ())),
        preferred_element_type=jnp.float32)

    @pl.when(k == pl.num_programs(1) - 1)
    def _():
        y = acc_ref[...]                      # f32 (B, tn)
        if rescale:
            # Linear bias is skipped: BatchNorm subtracts the batch mean, so a
            # per-feature bias cancels exactly (documented rounding-only delta
            # vs. torch, well inside bf16 tolerance).
            inv_b = jnp.float32(1.0 / batch)
            mean = jnp.sum(y, axis=0, keepdims=True) * inv_b
            d = y - mean
            var = jnp.sum(d * d, axis=0, keepdims=True) * inv_b  # biased (training)
            # Fused affine: 2 VPU ops/element instead of 4; rsqrt goes to EUP.
            scale = g_ref[...] * lax.rsqrt(var + BN_EPS)
            shift = be_ref[...] - mean * scale
            out_ref[...] = (y * scale + shift).astype(out_ref.dtype)
        else:
            out_ref[...] = (y + b_ref[...]).astype(out_ref.dtype)


def layer_wrapper_forward(x, w, b, gamma, beta, *, rescale=True,
                          compute_dtype=jnp.bfloat16, out_dtype=None,
                          tn=None, tk=None):
    """x: (B, Din), w: (Dout, Din) [untransposed], b/gamma/beta: (Dout,)."""
    B, Din = x.shape
    Dout, Din_w = w.shape
    assert Din_w == Din
    if out_dtype is None:
        out_dtype = x.dtype

    tn_max, tk_max, vmem_cap = _gen_params(_device_kind())
    x_bytes = jnp.dtype(x.dtype).itemsize
    w_bytes = jnp.dtype(w.dtype).itemsize
    o_bytes = jnp.dtype(out_dtype).itemsize

    auto_tiles = tn is None and tk is None
    # Tile selection: use the full dim when it fits (no padding, no HBM round
    # trip for pad/slice); otherwise lane-dense 128-multiples.
    if tk is None:
        tk = Din if Din <= tk_max else tk_max
    if tn is None:
        tn = Dout if Dout <= tn_max else tn_max
    if tk != Din:
        assert tk % 128 == 0, "tk must be a multiple of 128 when tiling Din"
    if tn != Dout:
        assert tn % 128 == 0, "tn must be a multiple of 128 when tiling Dout"

    if auto_tiles:
        # Shrink tiles if the double-buffered footprint exceeds this generation's
        # VMEM budget (batch is never tiled, so B sets the floor).
        while (_vmem_need(B, tn, tk, x_bytes, w_bytes, o_bytes) > vmem_cap
               and tk != Din and tk >= 256):
            tk //= 2
        while (_vmem_need(B, tn, tk, x_bytes, w_bytes, o_bytes) > vmem_cap
               and tn != Dout and tn >= 256):
            tn //= 2
    need = _vmem_need(B, tn, tk, x_bytes, w_bytes, o_bytes)
    if need > vmem_cap:
        # TODO(synk): add batch tiling with a two-pass BN (per-feature sum /
        # sum-of-squares accumulation) for very large B instead of failing.
        raise ValueError(
            f"LayerWrapper kernel: batch={B} with tiles (tn={tn}, tk={tk}) needs "
            f"~{need >> 20} MiB VMEM > budget {vmem_cap >> 20} MiB.")

    Dinp = Din if tk == Din else _round_up(Din, tk)
    Doutp = Dout if tn == Dout else _round_up(Dout, tn)

    # Zero-pad only the dims actually being tiled (no-op for aligned / small shapes).
    if Dinp != Din:
        x = jnp.pad(x, ((0, 0), (0, Dinp - Din)))
    if (Doutp, Dinp) != (Dout, Din):
        w = jnp.pad(w, ((0, Doutp - Dout), (0, Dinp - Din)))
    if Doutp != Dout:
        b = jnp.pad(b, (0, Doutp - Dout))
        gamma = jnp.pad(gamma, (0, Doutp - Dout))
        beta = jnp.pad(beta, (0, Doutp - Dout))

    b2 = b.reshape(1, Doutp).astype(jnp.float32)
    g2 = gamma.reshape(1, Doutp).astype(jnp.float32)
    be2 = beta.reshape(1, Doutp).astype(jnp.float32)

    grid = (Doutp // tn, Dinp // tk)

    kernel = functools.partial(
        _layer_wrapper_kernel, rescale=rescale, batch=B,
        compute_dtype=compute_dtype)

    out = pl.pallas_call(
        kernel,
        out_shape=jax.ShapeDtypeStruct((B, Doutp), out_dtype),
        grid=grid,
        in_specs=[
            pl.BlockSpec((B, tk), lambda j, k: (0, k)),    # x
            pl.BlockSpec((tn, tk), lambda j, k: (j, k)),   # w (untransposed)
            pl.BlockSpec((1, tn), lambda j, k: (0, j)),    # bias
            pl.BlockSpec((1, tn), lambda j, k: (0, j)),    # gamma
            pl.BlockSpec((1, tn), lambda j, k: (0, j)),    # beta
        ],
        out_specs=pl.BlockSpec((B, tn), lambda j, k: (0, j)),
        scratch_shapes=[pltpu.VMEM((B, tn), jnp.float32)],
        compiler_params=pltpu.CompilerParams(
            dimension_semantics=("parallel", "arbitrary"),
            vmem_limit_bytes=int(min(vmem_cap, max(need, 32 << 20)))),
    )(x, w, b2, g2, be2)

    if Doutp != Dout:
        out = out[:, :Dout]
    return out


def _reference(x, w, b, gamma, beta, rescale):
    xc = x.astype(jnp.float32)
    wc = w.astype(jnp.float32)
    y = lax.dot_general(xc, wc, (((1,), (1,)), ((), ())),
                        preferred_element_type=jnp.float32)
    y = y + b[None, :].astype(jnp.float32)
    if rescale:
        mean = jnp.mean(y, axis=0, keepdims=True)
        var = jnp.mean((y - mean) ** 2, axis=0, keepdims=True)
        return (gamma[None, :] * (y - mean) * lax.rsqrt(var + BN_EPS)
                + beta[None, :])
    return y


if __name__ == "__main__":
    key = jax.random.PRNGKey(0)
    kx, kw, kb, kg, kbe = jax.random.split(key, 5)

    # Shapes consistent with the module: Linear(48 -> 40), batch = 10.
    B, Din, Dout = 10, 48, 40
    x_f32 = jax.random.normal(kx, (B, Din), dtype=jnp.float32)
    w_f32 = jax.random.normal(kw, (Dout, Din), dtype=jnp.float32) * 0.1
    b = jax.random.normal(kb, (Dout,), dtype=jnp.float32) * 0.1
    gamma = 1.0 + 0.1 * jax.random.normal(kg, (Dout,), dtype=jnp.float32)
    beta = 0.1 * jax.random.normal(kbe, (Dout,), dtype=jnp.float32)

    # Parameter-level bf16 storage: halves the HBM weight/activation stream the
    # kernel is bound on (no per-call cast round trip).
    x = x_f32.astype(jnp.bfloat16)
    w = w_f32.astype(jnp.bfloat16)

    # rescale=True: Linear -> BatchNorm1d (training-mode batch stats).
    out = jax.block_until_ready(
        layer_wrapper_forward(x, w, b, gamma, beta, rescale=True))
    ref = _reference(x, w, b, gamma, beta, True)
    assert out.shape == (B, Dout)
    assert jnp.allclose(out.astype(jnp.float32), ref, atol=2e-2, rtol=2e-2), \
        "rescale=True mismatch"

    # rescale=False: raw Linear output y = x @ W^T + b.
    out2 = jax.block_until_ready(
        layer_wrapper_forward(x, w, b, gamma, beta, rescale=False))
    ref2 = _reference(x, w, b, gamma, beta, False)
    assert jnp.allclose(out2.astype(jnp.float32), ref2, atol=2e-2, rtol=2e-2), \
        "rescale=False mismatch"

    # Larger aligned shape exercising multi-tile Dout ("parallel") and K
    # accumulation ("arbitrary") with explicit tiles.
    B2, Din2, Dout2 = 64, 1024, 512
    x2 = jax.random.normal(kx, (B2, Din2), dtype=jnp.bfloat16)
    w2 = (jax.random.normal(kw, (Dout2, Din2), dtype=jnp.float32)
          * 0.05).astype(jnp.bfloat16)
    b2v = jax.random.normal(kb, (Dout2,), dtype=jnp.float32) * 0.1
    g2v = 1.0 + 0.1 * jax.random.normal(kg, (Dout2,), dtype=jnp.float32)
    be2v = 0.1 * jax.random.normal(kbe, (Dout2,), dtype=jnp.float32)
    out3 = jax.block_until_ready(
        layer_wrapper_forward(x2, w2, b2v, g2v, be2v, rescale=True,
                              tn=256, tk=512))
    ref3 = _reference(x2, w2, b2v, g2v, be2v, True)
    assert jnp.allclose(out3.astype(jnp.float32), ref3, atol=2e-2, rtol=2e-2), \
        "tiled path mismatch"

    print("KERNEL_OK")
</pallas_src>

<mosaic_0001>
module attributes {stable_mosaic.version = 11 : i64} {
  func.func @_layer_wrapper_kernel(%arg0: i32, %arg1: i32, %arg2: memref<10x48xbf16, #tpu.memory_space<vmem>>, %arg3: memref<40x48xbf16, #tpu.memory_space<vmem>>, %arg4: memref<1x40xf32, #tpu.memory_space<vmem>>, %arg5: memref<1x40xf32, #tpu.memory_space<vmem>>, %arg6: memref<1x40xf32, #tpu.memory_space<vmem>>, %arg7: memref<10x40xbf16, #tpu.memory_space<vmem>>, %arg8: memref<10x40xf32, #tpu.memory_space<vmem>>) attributes {dimension_semantics = [#tpu.dimension_semantics<parallel>, #tpu.dimension_semantics<arbitrary>], iteration_bounds = array<i64: 1, 1>, scalar_prefetch = 0 : i64, scratch_operands = 1 : i64, tpu.core_type = #tpu.core_type<tc>, window_params = [{transform_indices = @transform_0, window_bounds = array<i64: 10, 48>}, {transform_indices = @transform_1, window_bounds = array<i64: 40, 48>}, {transform_indices = @transform_2, window_bounds = array<i64: 1, 40>}, {transform_indices = @transform_3, window_bounds = array<i64: 1, 40>}, {transform_indices = @transform_4, window_bounds = array<i64: 1, 40>}, {transform_indices = @transform_5, window_bounds = array<i64: 10, 40>}]} {
    %c0_i32 = arith.constant 0 : i32
    %0 = arith.cmpi eq, %arg1, %c0_i32 : i32
    %1 = arith.extui %0 : i1 to i32
    %c0_i32_0 = arith.constant 0 : i32
    %2 = arith.cmpi ne, %1, %c0_i32_0 : i32
    scf.if %2 {
      %cst_10 = arith.constant 0.000000e+00 : f32
      %12 = vector.broadcast %cst_10 : f32 to vector<10x40xf32>
      %c0_11 = arith.constant 0 : index
      %c0_12 = arith.constant 0 : index
      %13 = vector.load %arg8[%c0_11, %c0_12] : memref<10x40xf32, #tpu.memory_space<vmem>>, vector<10x40xf32>
      tpu.vector_store %arg8[%c0_11, %c0_12], %12 {strides = array<i32>} : memref<10x40xf32, #tpu.memory_space<vmem>>, vector<10x40xf32>,
    } else {
    }
    %c0 = arith.constant 0 : index
    %c0_1 = arith.constant 0 : index
    %3 = vector.load %arg2[%c0, %c0_1] : memref<10x48xbf16, #tpu.memory_space<vmem>>, vector<10x48xbf16>
    %c0_2 = arith.constant 0 : index
    %c0_3 = arith.constant 0 : index
    %4 = vector.load %arg3[%c0_2, %c0_3] : memref<40x48xbf16, #tpu.memory_space<vmem>>, vector<40x48xbf16>
    %c0_4 = arith.constant 0 : index
    %c0_5 = arith.constant 0 : index
    %5 = vector.load %arg8[%c0_4, %c0_5] : memref<10x40xf32, #tpu.memory_space<vmem>>, vector<10x40xf32>
    %cst = arith.constant dense<0.000000e+00> : vector<10x40xf32>
    %6 = tpu.matmul %3, %4, %cst {dimension_numbers = #tpu.dot_dimension_numbers<[1], [1], [0], [0], [0, 0, 1, 0], [], []>} : vector<10x48xbf16>, vector<40x48xbf16>, vector<10x40xf32> -> vector<10x40xf32>
    %7 = arith.addf %5, %6 : vector<10x40xf32>
    %c0_6 = arith.constant 0 : index
    %c0_7 = arith.constant 0 : index
    %8 = vector.load %arg8[%c0_6, %c0_7] : memref<10x40xf32, #tpu.memory_space<vmem>>, vector<10x40xf32>
    tpu.vector_store %arg8[%c0_6, %c0_7], %7 {strides = array<i32>} : memref<10x40xf32, #tpu.memory_space<vmem>>, vector<10x40xf32>,
    %c0_i32_8 = arith.constant 0 : i32
    %9 = arith.cmpi eq, %arg1, %c0_i32_8 : i32
    %10 = arith.extui %9 : i1 to i32
    %c0_i32_9 = arith.constant 0 : i32
    %11 = arith.cmpi ne, %10, %c0_i32_9 : i32
    scf.if %11 {
      %c0_10 = arith.constant 0 : index
      %c0_11 = arith.constant 0 : index
      %12 = vector.load %arg8[%c0_10, %c0_11] : memref<10x40xf32, #tpu.memory_space<vmem>>, vector<10x40xf32>
      %cst_12 = arith.constant dense<0.000000e+00> : vector<40xf32>
      %13 = vector.multi_reduction <add>, %12, %cst_12 [0] : vector<10x40xf32> to vector<40xf32>
      %14 = vector.shape_cast %13 : vector<40xf32> to vector<1x40xf32>
      %cst_13 = arith.constant 1.000000e-01 : f32
      %15 = vector.broadcast %cst_13 : f32 to vector<1x40xf32>
      %16 = arith.mulf %14, %15 : vector<1x40xf32>
      %17 = vector.broadcast %16 : vector<1x40xf32> to vector<10x40xf32>
      %18 = arith.subf %12, %17 : vector<10x40xf32>
      %19 = arith.mulf %18, %18 : vector<10x40xf32>
      %cst_14 = arith.constant dense<0.000000e+00> : vector<40xf32>
      %20 = vector.multi_reduction <add>, %19, %cst_14 [0] : vector<10x40xf32> to vector<40xf32>
      %21 = vector.shape_cast %20 : vector<40xf32> to vector<1x40xf32>
      %cst_15 = arith.constant 1.000000e-01 : f32
      %22 = vector.broadcast %cst_15 : f32 to vector<1x40xf32>
      %23 = arith.mulf %21, %22 : vector<1x40xf32>
      %c0_16 = arith.constant 0 : index
      %c0_17 = arith.constant 0 : index
      %24 = vector.load %arg5[%c0_16, %c0_17] : memref<1x40xf32, #tpu.memory_space<vmem>>, vector<1x40xf32>
      %cst_18 = arith.constant 9.99999974E-6 : f32
      %25 = vector.broadcast %cst_18 : f32 to vector<1x40xf32>
      %26 = arith.addf %23, %25 : vector<1x40xf32>
      %27 = math.rsqrt %26 : vector<1x40xf32>
      %28 = arith.mulf %24, %27 : vector<1x40xf32>
      %c0_19 = arith.constant 0 : index
      %c0_20 = arith.constant 0 : index
      %29 = vector.load %arg6[%c0_19, %c0_20] : memref<1x40xf32, #tpu.memory_space<vmem>>, vector<1x40xf32>
      %30 = arith.mulf %16, %28 : vector<1x40xf32>
      %31 = arith.subf %29, %30 : vector<1x40xf32>
      %32 = vector.broadcast %28 : vector<1x40xf32> to vector<10x40xf32>
      %33 = arith.mulf %12, %32 : vector<10x40xf32>
      %34 = vector.broadcast %31 : vector<1x40xf32> to vector<10x40xf32>
      %35 = arith.addf %33, %34 : vector<10x40xf32>
      %36 = arith.truncf %35 : vector<10x40xf32> to vector<10x40xbf16>
      %c0_21 = arith.constant 0 : index
      %c0_22 = arith.constant 0 : index
      %37 = vector.load %arg7[%c0_21, %c0_22] : memref<10x40xbf16, #tpu.memory_space<vmem>>, vector<10x40xbf16>
      tpu.vector_store %arg7[%c0_21, %c0_22], %36 {strides = array<i32>} : memref<10x40xbf16, #tpu.memory_space<vmem>>, vector<10x40xbf16>,
    } else {
    }
    return
  }
  func.func @transform_0(%arg0: i32, %arg1: i32) -> (i32, i32) {
    %c0_i32 = arith.constant 0 : i32
    %c0_i32_0 = arith.constant 0 : i32
    return %c0_i32, %arg1 : i32, i32
  }
  func.func @transform_1(%arg0: i32, %arg1: i32) -> (i32, i32) {
    %c0_i32 = arith.constant 0 : i32
    return %arg0, %arg1 : i32, i32
  }
  func.func @transform_2(%arg0: i32, %arg1: i32) -> (i32, i32) {
    %c0_i32 = arith.constant 0 : i32
    %c0_i32_0 = arith.constant 0 : i32
    return %c0_i32, %arg0 : i32, i32
  }
  func.func @transform_3(%arg0: i32, %arg1: i32) -> (i32, i32) {
    %c0_i32 = arith.constant 0 : i32
    %c0_i32_0 = arith.constant 0 : i32
    return %c0_i32, %arg0 : i32, i32
  }
  func.func @transform_4(%arg0: i32, %arg1: i32) -> (i32, i32) {
    %c0_i32 = arith.constant 0 : i32
    %c0_i32_0 = arith.constant 0 : i32
    return %c0_i32, %arg0 : i32, i32
  }
  func.func @transform_5(%arg0: i32, %arg1: i32) -> (i32, i32) {
    %c0_i32 = arith.constant 0 : i32
    %c0_i32_0 = arith.constant 0 : i32
    return %c0_i32, %arg0 : i32, i32
  }
}

</mosaic_0001>

<bundles_post_ra>
// kernel: tpu_custom_call.1
= control target key start
LH: loop header
LB: loop body
LE: loop exit
PB: predicated region body
PF: predicated region fallthrough
CT: control target
= control target key end

     0   :  { %10 = vsyncpa [#allocation4], 0  ;;  %s398_s0 = inlined_call_operand.hbm [shape: bf16[10,48], index: 0, kind: input, shape index: {}]   ;;  %s399_s1 = inlined_call_operand.hbm [shape: bf16[40,48], index: 1, kind: input, shape index: {}]   ;;  %s400_s2 = inlined_call_operand.vmem [shape: f32[1,40], index: 2, kind: input, shape index: {}]   ;;  %s401_s3 = inlined_call_operand.vmem [shape: f32[1,40], index: 3, kind: input, shape index: {}]   ;;  %s402_s4 = inlined_call_operand.vmem [shape: f32[1,40], index: 4, kind: input, shape index: {}]   ;;  %s403_s5 = inlined_call_operand.hbm [shape: bf16[10,40], index: 5, kind: output, shape index: {}]  }
   0x1   :  { %11 = vsyncpa [#allocation7], 0 }
   0x2   :  { %12 = vsyncpa [#allocation5], 0  ;;  %s329_s18 = smov [#allocation3]  }
   0x3   :  { %s18_s19 = sshll.u32 %s329_s18, 4  ;;  %s19_s19 = int_to_ptr.vmem [resolvable:$true] %s18_s19 }
   0x4   :  { %s271_s20 = scalar_lea.vmem %s19_s19, 128  ;;  %p276_p1 = scmp.lt.s32.totalorder %s19_s19, %s19_s19 }
   0x5   :  { %p272_p0 = scmp.ne.s32.totalorder %s19_s19, %s271_s20  ;;  %p277_p2 = scmp.lt.s32.totalorder %s271_s20, %s271_s20 }
   0x7   :  { %p278_p3 = por %p277_p2, %p276_p1 }
   0x9   :  { %p279_p4 = pnand %p278_p3, %p272_p0 }
   0xb   :  { %282 = shalt.err (!%p279_p4)
}
   0xc   :  { %s330_s2 = smov 64   ;;  %s331_s21 = smov 4  }
   0xd   :  { %24 = dma.hbm_to_vmem [thread:$0]  %s398_s0, 128, %s19_s19, [#allocation4], %s330_s2, %s330_s2, %s331_s21  }
   0xe   :  { %s332_s24 = smov [#allocation6]  }
   0xf   :  { %s30_s25 = sshll.u32 %s332_s24, 4  ;;  %s31_s25 = int_to_ptr.vmem [resolvable:$true] %s30_s25 }
  0x10   :  { %s291_s26 = scalar_lea.vmem %s31_s25, 320  ;;  %p296_p6 = scmp.lt.s32.totalorder %s31_s25, %s31_s25 }
  0x11   :  { %p292_p5 = scmp.ne.s32.totalorder %s31_s25, %s291_s26  ;;  %p297_p7 = scmp.lt.s32.totalorder %s291_s26, %s291_s26 }
  0x13   :  { %p298_p8 = por %p297_p7, %p296_p6 }
  0x15   :  { %p299_p9 = pnand %p298_p8, %p292_p5 }
  0x17   :  { %302 = shalt.err (!%p299_p9)
}
  0x18   :  { %36 = dma.hbm_to_vmem [thread:$0]  %s399_s1, 320, %s31_s25, [#allocation7], %s330_s2, %s330_s2, %s331_s21  }
  0x19   :  { %323 = dma.done.wait [#allocation4], 128  }
  0x1a   :  { %324 = vsyncadd [#allocation4], 4294967168 }
  0x1b   :  { %325 = dma.done.wait [#allocation7], 320  }
  0x1c   :  { %326 = vsyncadd [#allocation7], 4294966976  ;;  %vm54_vm0 = vcmask 326656   ;;  %v333_v0 = vmov 0.0   ;;  %vm334_vm1 = vmmov 0   ;;  %vm85_vm2 = vcmask 392192  }
  0x1d   :  { %240 = vmatprep.subr.bf16.mxu0 %v333_v0  ;;  %246 = vmatprep.mubr.msk.bf16.mxu0 %vm334_vm1, %v333_v0  ;;  %55 = vst.msk [vmem:[#allocation2] sm:$0xff] %vm54_vm0, %v333_v0  ;;  %v257_v1 = vld [vmem:[#allocation6 + $0x10] ss:$0 sps:$4 sm:$0xff]   ;;  %v258_v3 = vld [vmem:[#allocation6 + $0x8] sm:$0xff]   ;;  %v259_v5 = vld [vmem:[#allocation6] sm:$0xff]   ;;  %vm56_vm3 = vcmask 320512   ;;  %v182_v43 = vlaneseq }
  0x1e   :  { %v96_v2 = vsel %vm85_vm2, %v257_v1, 0  ;;  %v93_v4 = vsel %vm85_vm2, %v258_v3, 0  ;;  %v90_v6 = vsel %vm85_vm2, %v259_v5, 0  ;;  %v260_v7 = vld [vmem:[#allocation3] sm:$0x1f]   ;;  %s335_s6 = smov [#allocation8]  }
  0x1f   :  { %241 = vmatpush3.bf16.xpose.msra.mxu0 %v96_v2  ;;  %57 = vst.msk [vmem:[#allocation2 + $0x8] sm:$0x3] %vm56_vm3, %v333_v0  ;;  %v183_v44 = vshrl.u32 %v182_v43, 7  ;;  %v174_v45 = vld [vmem:[%s401_s3] sm:$0x1]  ;;  %s214_s7 = sshll.u32 %s335_s6, 4  ;;  %s215_s7 = int_to_ptr.vmem [resolvable:$true] %s214_s7 }
  0x20   :  { %242 = vmatprep.subr.bf16.mxu0 %v333_v0  ;;  %v178_v49 = vld [vmem:[%s402_s4] sm:$0x1]  ;;  %vm205_vm4 = vcmask 322560   ;;  %vm207_vm5 = vcmask 319488   ;;  %s303_s3 = scalar_lea.vmem %s215_s7, 128  ;;  %p308_p11 = scmp.lt.s32.totalorder %s215_s7, %s215_s7 }
  0x21   :  { %v184_v46 = vsub.s32 0, %v183_v44  ;;  %p304_p10 = scmp.ne.s32.totalorder %s215_s7, %s303_s3  ;;  %p309_p12 = scmp.lt.s32.totalorder %s303_s3, %s303_s3 }
  0x23   :  { %p310_p13 = por %p309_p12, %p308_p11 }
  0x24   :  { %v65_v8 = vld [vmem:[#allocation2] sm:$0xff] }
  0x25   :  { %p311_p0 = pnand %p310_p13, %p304_p10 }
  0x26   :  { %v66_v12 = vld [vmem:[#allocation2 + $0x8] sm:$0x3] }
  0x27   :  { %243 = vmatpush3.bf16.xpose.msra.mxu0 %v93_v4 }
  0x28   :  { %244 = vmatprep.subr.bf16.mxu0 %v333_v0 }
  0x2f   :  { %245 = vmatpush3.bf16.xpose.msra.mxu0 %v90_v6 }
  0x36   :  { %247 = vmatmul.mubr.msk.bf16.vlgmr.msra.gmra.mxu0 %vm85_vm2, %v260_v7 }
  0xf6   :  { %v132_v9 = vpop.f32.mrf.mxu0 }
  0xf7   :  { %v139_v10 = vadd.f32 %v132_v9, %v65_v8 }
  0xf8   :  { %v248_v11 = vpop.f32.mrf.mxu0 }
  0xf9   :  { %142 = vst.msk [vmem:[#allocation2] sm:$0xff] %vm54_vm0, %v139_v10 }
  0xfa   :  { %v135_v13 = vpop.f32.mrf.mxu0 }
  0xfb   :  { %v140_v14 = vadd.f32 %v135_v13, %v66_v12 }
  0xfc   :  { %v249_v15 = vpop.f32.mrf.mxu0 }
  0xfd   :  { %144 = vst.msk [vmem:[#allocation2 + $0x8] sm:$0x3] %vm56_vm3, %v140_v14 }
 0x100   :  { %v148_v16 = vld [vmem:[#allocation2] sm:$0xff] }
 0x101   :  { %v150_v18 = vsel %vm54_vm0, %v148_v16, 0.0 }
 0x104   :  { %v149_v17 = vld [vmem:[#allocation2 + $0x8] sm:$0x3] }
 0x105   :  { %v151_v19 = vsel %vm56_vm3, %v149_v17, 0.0 }
 0x106   :  { %v152_v20 = vadd.f32 %v151_v19, %v150_v18 }
 0x108   :  { %v153_v21 = vrot.slane %v152_v20, 4 }
 0x10a   :  { %v154_v22 = vadd.f32 %v153_v21, %v152_v20 }
 0x10c   :  { %v155_v23 = vrot.slane %v154_v22, 2 }
 0x10e   :  { %v156_v24 = vadd.f32 %v155_v23, %v154_v22 }
 0x110   :  { %v157_v25 = vrot.slane %v156_v24, 1 }
 0x112   :  { %v158_v26 = vadd.f32 %v157_v25, %v156_v24 }
 0x114   :  { %v159_v27 = vmul.f32 0.1, %v158_v26 }
 0x116   :  { %v160_v28 = vsub.f32 %v148_v16, %v159_v27  ;;  %v161_v29 = vsub.f32 %v149_v17, %v159_v27 }
 0x118   :  { %v162_v30 = vmul.f32 %v160_v28, %v160_v28  ;;  %v163_v31 = vmul.f32 %v161_v29, %v161_v29 }
 0x11a   :  { %v164_v32 = vsel %vm54_vm0, %v162_v30, 0.0  ;;  %v165_v33 = vsel %vm56_vm3, %v163_v31, 0.0 }
 0x11b   :  { %v166_v34 = vadd.f32 %v165_v33, %v164_v32 }
 0x11d   :  { %v167_v35 = vrot.slane %v166_v34, 4 }
 0x11f   :  { %v168_v36 = vadd.f32 %v167_v35, %v166_v34 }
 0x121   :  { %v169_v37 = vrot.slane %v168_v36, 2 }
 0x123   :  { %v170_v38 = vadd.f32 %v169_v37, %v168_v36 }
 0x125   :  { %v171_v39 = vrot.slane %v170_v38, 1 }
 0x127   :  { %v172_v40 = vadd.f32 %v171_v39, %v170_v38 }
 0x129   :  { %v173_v41 = vmul.f32 0.1, %v172_v40 }
 0x12b   :  { %v175_v42 = vadd.f32 1e-05, %v173_v41 }
 0x12d   :  { %261 = vrsqrt.f32 %v175_v42 }
 0x13a   :  { %v262_v47 = vpop.eup %261 }
 0x13b   :  { %v177_v48 = vmul.f32 %v262_v47, %v174_v45 }
 0x13d   :  { %v179_v50 = vmul.f32 %v177_v48, %v159_v27  ;;  %v185_v51 = vrot.slane %v177_v48, %v184_v46 }
 0x13f   :  { %v180_v52 = vsub.f32 %v178_v49, %v179_v50  ;;  %v187_v53 = vmul.f32 %v185_v51, %v148_v16  ;;  %v188_v54 = vmul.f32 %v185_v51, %v149_v17 }
 0x141   :  { %v193_v55 = vrot.slane %v180_v52, %v184_v46 }
 0x143   :  { %v195_v56 = vadd.f32 %v193_v55, %v187_v53  ;;  %v196_v57 = vadd.f32 %v193_v55, %v188_v54 }
 0x145   :  { %v234_v58 = vpack.c.bf16 %v195_v56, %v195_v56  ;;  %v235_v59 = vpack.c.bf16 %v196_v57, %v196_v57 }
 0x147   :  { %206 = vst.msk [vmem:[#allocation8] sm:$0xf] %vm205_vm4, %v234_v58 }
 0x148   :  { %208 = vst.msk [vmem:[#allocation8 + $0x4] sm:$0x1] %vm207_vm5, %v235_v59 }
 0x149   :  { %314 = shalt.err (!%p311_p0)
}
 0x14a   :  { %220 = dma.vmem_to_hbm [thread:$0]  %s215_s7, 128, %s403_s5, [#allocation5], %s330_s2, %s330_s2, %s331_s21  }
 0x14b   :  { %327 = dma.done.wait [#allocation5], 128  }
 0x14c   :  { %328 = vsyncadd [#allocation5], 4294967168 }
 0x14d   :  { %224 = vsyncpa [#allocation4], 1 }
 0x14e   :  { %225 = vsyncpa [#allocation7], 1 }
 0x14f   :  { %226 = vsyncpa [#allocation5], 1 }

</bundles_post_ra>
